<compile_context>
chip_gen: v7x
topology: tpu7x:2x2x1
jax: 0.10.0
libtpu: 0.0.40
codegen_flags: <defaults>
</compile_context>

<pallas_src>
import jax
import jax.numpy as jnp
from jax.experimental import pallas as pl
from jax.experimental.pallas import tpu as pltpu


def _conv1x1_kernel(w_ref, b_ref, x_ref, o_ref):
    """Per-pixel channel mix on the VPU.

    w_ref: (C_out, C_in) f32 in SMEM (scalar reads)
    b_ref: (C_out,)      f32 in SMEM (scalar reads)
    x_ref: (1, C_in, TP) f32 in VMEM (pixels lane-dense on the last axis)
    o_ref: (1, C_out, TP) f32 in VMEM
    """
    c_in = x_ref.shape[1]
    c_out = o_ref.shape[1]

    # Load each input channel row once; each is a lane-dense (1, TP) vector.
    xs = [x_ref[0, ci:ci + 1, :].astype(jnp.float32) for ci in range(c_in)]

    # y[co, :] = sum_ci w[co, ci] * x[ci, :] + b[co]   (C_out*C_in broadcast FMAs)
    for co in range(c_out):
        acc = xs[0] * w_ref[co, 0]
        for ci in range(1, c_in):
            acc = acc + xs[ci] * w_ref[co, ci]
        o_ref[0, co:co + 1, :] = (acc + b_ref[co]).astype(o_ref.dtype)


def conv1x1_channels_first(x_bcp, weight, bias, *, max_pixel_tile=2048):
    """x_bcp: (B, C_in, P) f32; weight: (C_out, C_in); bias: (C_out,) -> (B, C_out, P)."""
    B, C_in, P = x_bcp.shape
    C_out = weight.shape[0]

    # Lane-dense pixel tile: multiple of 128, as large as reasonable (amortizes
    # the ~0.35us per-grid-step overhead on this purely HBM-bound op).
    P_pad = ((P + 127) // 128) * 128
    tp = min(max_pixel_tile, P_pad)
    n_tiles = pl.cdiv(P_pad, tp)
    P_pad = n_tiles * tp
    if P_pad != P:
        x_bcp = jnp.pad(x_bcp, ((0, 0), (0, 0), (0, P_pad - P)))

    out = pl.pallas_call(
        _conv1x1_kernel,
        out_shape=jax.ShapeDtypeStruct((B, C_out, P_pad), x_bcp.dtype),
        grid_spec=pltpu.PrefetchScalarGridSpec(
            num_scalar_prefetch=0,
            grid=(B, n_tiles),
            in_specs=[
                pl.BlockSpec(memory_space=pltpu.MemorySpace.SMEM),      # weight (C_out, C_in)
                pl.BlockSpec(memory_space=pltpu.MemorySpace.SMEM),      # bias   (C_out,)
                pl.BlockSpec((1, C_in, tp), lambda b, p: (b, 0, p)),    # activations
            ],
            out_specs=pl.BlockSpec((1, C_out, tp), lambda b, p: (b, 0, p)),
        ),
        compiler_params=pltpu.CompilerParams(
            dimension_semantics=("parallel", "parallel"),
            # Explicit VMEM budget (safe on v7x's 64 MiB); our double-buffered
            # blocks are tiny (< 1 MiB total) so this is just belt-and-braces.
            vmem_limit_bytes=32 * 1024 * 1024,
        ),
    )(weight, bias, x_bcp)

    if P_pad != P:
        out = out[:, :, :P]
    return out


def decoder_conv2d_forward(x, weight, bias):
    """x: (B, 1, C_in, H, W); weight: (C_out, C_in); bias: (C_out,)
    Returns (B, 1, C_out, H, W), matching the PyTorch module."""
    B, one, C_in, H, W = x.shape
    assert one == 1
    C_out = weight.shape[0]

    # Free reshapes only (contiguous dims collapse) -- no transposes.
    x_bcp = x.reshape(B, C_in, H * W)                 # (B, C_in, P), channels-first
    y_bcp = conv1x1_channels_first(x_bcp, weight, bias)   # (B, C_out, P)
    return y_bcp.reshape(B, C_out, H, W)[:, None]     # (B, 1, C_out, H, W)


if __name__ == "__main__":
    # Small shapes consistent with the module: op_size (C_in)=4, output_channels=4.
    B, C_in, C_out, H, W = 2, 4, 4, 16, 16

    key = jax.random.PRNGKey(0)
    kx, kw, kb = jax.random.split(key, 3)

    # Deterministic parameter init mimicking nn.Conv2d defaults
    # (uniform(-1/sqrt(fan_in), 1/sqrt(fan_in)), fan_in = C_in * 1 * 1).
    bound = 1.0 / jnp.sqrt(jnp.float32(C_in))
    weight = jax.random.uniform(kw, (C_out, C_in), jnp.float32, -bound, bound)
    bias = jax.random.uniform(kb, (C_out,), jnp.float32, -bound, bound)

    x = jax.random.normal(kx, (B, 1, C_in, H, W), jnp.float32)

    y = decoder_conv2d_forward(x, weight, bias)
    y = jax.block_until_ready(y)

    # Reference check in plain JAX (1x1 conv == einsum over channel dim).
    y_ref = jnp.einsum("bchw,oc->bohw", x[:, 0], weight) + bias[None, :, None, None]
    y_ref = y_ref[:, None]
    assert y.shape == (B, 1, C_out, H, W)
    assert jnp.allclose(y, y_ref, atol=1e-5, rtol=1e-5)

    print("KERNEL_OK")
</pallas_src>

<mosaic_0001>
module attributes {stable_mosaic.version = 11 : i64} {
  func.func @_conv1x1_kernel(%arg0: i32, %arg1: i32, %arg2: memref<4x4xf32, #tpu.memory_space<smem>>, %arg3: memref<4xf32, #tpu.memory_space<smem>>, %arg4: memref<1x4x256xf32, #tpu.memory_space<vmem>>, %arg5: memref<1x4x256xf32, #tpu.memory_space<vmem>>) attributes {dimension_semantics = [#tpu.dimension_semantics<parallel>, #tpu.dimension_semantics<parallel>], iteration_bounds = array<i64: 2, 1>, scalar_prefetch = 0 : i64, scratch_operands = 0 : i64, tpu.core_type = #tpu.core_type<tc>, window_params = [{transform_indices = @transform_0, window_bounds = array<i64: 4, 4>}, {transform_indices = @transform_1, window_bounds = array<i64: 4>}, {transform_indices = @transform_2, window_bounds = array<i64: 1, 4, 256>}, {transform_indices = @transform_3, window_bounds = array<i64: 1, 4, 256>}]} {
    %c0 = arith.constant 0 : index
    %c0_0 = arith.constant 0 : index
    %c0_1 = arith.constant 0 : index
    %0 = vector.load %arg4[%c0, %c0_0, %c0_1] : memref<1x4x256xf32, #tpu.memory_space<vmem>>, vector<1x1x256xf32>
    %1 = vector.shape_cast %0 : vector<1x1x256xf32> to vector<1x256xf32>
    %c0_2 = arith.constant 0 : index
    %c1 = arith.constant 1 : index
    %c0_3 = arith.constant 0 : index
    %2 = vector.load %arg4[%c0_2, %c1, %c0_3] : memref<1x4x256xf32, #tpu.memory_space<vmem>>, vector<1x1x256xf32>
    %3 = vector.shape_cast %2 : vector<1x1x256xf32> to vector<1x256xf32>
    %c0_4 = arith.constant 0 : index
    %c2 = arith.constant 2 : index
    %c0_5 = arith.constant 0 : index
    %4 = vector.load %arg4[%c0_4, %c2, %c0_5] : memref<1x4x256xf32, #tpu.memory_space<vmem>>, vector<1x1x256xf32>
    %5 = vector.shape_cast %4 : vector<1x1x256xf32> to vector<1x256xf32>
    %c0_6 = arith.constant 0 : index
    %c3 = arith.constant 3 : index
    %c0_7 = arith.constant 0 : index
    %6 = vector.load %arg4[%c0_6, %c3, %c0_7] : memref<1x4x256xf32, #tpu.memory_space<vmem>>, vector<1x1x256xf32>
    %7 = vector.shape_cast %6 : vector<1x1x256xf32> to vector<1x256xf32>
    %c0_8 = arith.constant 0 : index
    %c0_9 = arith.constant 0 : index
    %8 = memref.load %arg2[%c0_8, %c0_9] : memref<4x4xf32, #tpu.memory_space<smem>>
    %9 = vector.broadcast %8 : f32 to vector<1x256xf32>
    %10 = arith.mulf %1, %9 : vector<1x256xf32>
    %c0_10 = arith.constant 0 : index
    %c1_11 = arith.constant 1 : index
    %11 = memref.load %arg2[%c0_10, %c1_11] : memref<4x4xf32, #tpu.memory_space<smem>>
    %12 = vector.broadcast %11 : f32 to vector<1x256xf32>
    %13 = arith.mulf %3, %12 : vector<1x256xf32>
    %14 = arith.addf %10, %13 : vector<1x256xf32>
    %c0_12 = arith.constant 0 : index
    %c2_13 = arith.constant 2 : index
    %15 = memref.load %arg2[%c0_12, %c2_13] : memref<4x4xf32, #tpu.memory_space<smem>>
    %16 = vector.broadcast %15 : f32 to vector<1x256xf32>
    %17 = arith.mulf %5, %16 : vector<1x256xf32>
    %18 = arith.addf %14, %17 : vector<1x256xf32>
    %c0_14 = arith.constant 0 : index
    %c3_15 = arith.constant 3 : index
    %19 = memref.load %arg2[%c0_14, %c3_15] : memref<4x4xf32, #tpu.memory_space<smem>>
    %20 = vector.broadcast %19 : f32 to vector<1x256xf32>
    %21 = arith.mulf %7, %20 : vector<1x256xf32>
    %22 = arith.addf %18, %21 : vector<1x256xf32>
    %c0_16 = arith.constant 0 : index
    %23 = memref.load %arg3[%c0_16] : memref<4xf32, #tpu.memory_space<smem>>
    %24 = vector.broadcast %23 : f32 to vector<1x256xf32>
    %25 = arith.addf %22, %24 : vector<1x256xf32>
    %c0_17 = arith.constant 0 : index
    %c0_18 = arith.constant 0 : index
    %c0_19 = arith.constant 0 : index
    %26 = vector.load %arg5[%c0_17, %c0_18, %c0_19] : memref<1x4x256xf32, #tpu.memory_space<vmem>>, vector<1x1x256xf32>
    %27 = vector.shape_cast %26 : vector<1x1x256xf32> to vector<1x256xf32>
    %28 = vector.shape_cast %25 : vector<1x256xf32> to vector<1x1x256xf32>
    tpu.vector_store %arg5[%c0_17, %c0_18, %c0_19], %28 {strides = array<i32>} : memref<1x4x256xf32, #tpu.memory_space<vmem>>, vector<1x1x256xf32>,
    %c1_20 = arith.constant 1 : index
    %c0_21 = arith.constant 0 : index
    %29 = memref.load %arg2[%c1_20, %c0_21] : memref<4x4xf32, #tpu.memory_space<smem>>
    %30 = vector.broadcast %29 : f32 to vector<1x256xf32>
    %31 = arith.mulf %1, %30 : vector<1x256xf32>
    %c1_22 = arith.constant 1 : index
    %c1_23 = arith.constant 1 : index
    %32 = memref.load %arg2[%c1_22, %c1_23] : memref<4x4xf32, #tpu.memory_space<smem>>
    %33 = vector.broadcast %32 : f32 to vector<1x256xf32>
    %34 = arith.mulf %3, %33 : vector<1x256xf32>
    %35 = arith.addf %31, %34 : vector<1x256xf32>
    %c1_24 = arith.constant 1 : index
    %c2_25 = arith.constant 2 : index
    %36 = memref.load %arg2[%c1_24, %c2_25] : memref<4x4xf32, #tpu.memory_space<smem>>
    %37 = vector.broadcast %36 : f32 to vector<1x256xf32>
    %38 = arith.mulf %5, %37 : vector<1x256xf32>
    %39 = arith.addf %35, %38 : vector<1x256xf32>
    %c1_26 = arith.constant 1 : index
    %c3_27 = arith.constant 3 : index
    %40 = memref.load %arg2[%c1_26, %c3_27] : memref<4x4xf32, #tpu.memory_space<smem>>
    %41 = vector.broadcast %40 : f32 to vector<1x256xf32>
    %42 = arith.mulf %7, %41 : vector<1x256xf32>
    %43 = arith.addf %39, %42 : vector<1x256xf32>
    %c1_28 = arith.constant 1 : index
    %44 = memref.load %arg3[%c1_28] : memref<4xf32, #tpu.memory_space<smem>>
    %45 = vector.broadcast %44 : f32 to vector<1x256xf32>
    %46 = arith.addf %43, %45 : vector<1x256xf32>
    %c0_29 = arith.constant 0 : index
    %c1_30 = arith.constant 1 : index
    %c0_31 = arith.constant 0 : index
    %47 = vector.load %arg5[%c0_29, %c1_30, %c0_31] : memref<1x4x256xf32, #tpu.memory_space<vmem>>, vector<1x1x256xf32>
    %48 = vector.shape_cast %47 : vector<1x1x256xf32> to vector<1x256xf32>
    %49 = vector.shape_cast %46 : vector<1x256xf32> to vector<1x1x256xf32>
    tpu.vector_store %arg5[%c0_29, %c1_30, %c0_31], %49 {strides = array<i32>} : memref<1x4x256xf32, #tpu.memory_space<vmem>>, vector<1x1x256xf32>,
    %c2_32 = arith.constant 2 : index
    %c0_33 = arith.constant 0 : index
    %50 = memref.load %arg2[%c2_32, %c0_33] : memref<4x4xf32, #tpu.memory_space<smem>>
    %51 = vector.broadcast %50 : f32 to vector<1x256xf32>
    %52 = arith.mulf %1, %51 : vector<1x256xf32>
    %c2_34 = arith.constant 2 : index
    %c1_35 = arith.constant 1 : index
    %53 = memref.load %arg2[%c2_34, %c1_35] : memref<4x4xf32, #tpu.memory_space<smem>>
    %54 = vector.broadcast %53 : f32 to vector<1x256xf32>
    %55 = arith.mulf %3, %54 : vector<1x256xf32>
    %56 = arith.addf %52, %55 : vector<1x256xf32>
    %c2_36 = arith.constant 2 : index
    %c2_37 = arith.constant 2 : index
    %57 = memref.load %arg2[%c2_36, %c2_37] : memref<4x4xf32, #tpu.memory_space<smem>>
    %58 = vector.broadcast %57 : f32 to vector<1x256xf32>
    %59 = arith.mulf %5, %58 : vector<1x256xf32>
    %60 = arith.addf %56, %59 : vector<1x256xf32>
    %c2_38 = arith.constant 2 : index
    %c3_39 = arith.constant 3 : index
    %61 = memref.load %arg2[%c2_38, %c3_39] : memref<4x4xf32, #tpu.memory_space<smem>>
    %62 = vector.broadcast %61 : f32 to vector<1x256xf32>
    %63 = arith.mulf %7, %62 : vector<1x256xf32>
    %64 = arith.addf %60, %63 : vector<1x256xf32>
    %c2_40 = arith.constant 2 : index
    %65 = memref.load %arg3[%c2_40] : memref<4xf32, #tpu.memory_space<smem>>
    %66 = vector.broadcast %65 : f32 to vector<1x256xf32>
    %67 = arith.addf %64, %66 : vector<1x256xf32>
    %c0_41 = arith.constant 0 : index
    %c2_42 = arith.constant 2 : index
    %c0_43 = arith.constant 0 : index
    %68 = vector.load %arg5[%c0_41, %c2_42, %c0_43] : memref<1x4x256xf32, #tpu.memory_space<vmem>>, vector<1x1x256xf32>
    %69 = vector.shape_cast %68 : vector<1x1x256xf32> to vector<1x256xf32>
    %70 = vector.shape_cast %67 : vector<1x256xf32> to vector<1x1x256xf32>
    tpu.vector_store %arg5[%c0_41, %c2_42, %c0_43], %70 {strides = array<i32>} : memref<1x4x256xf32, #tpu.memory_space<vmem>>, vector<1x1x256xf32>,
    %c3_44 = arith.constant 3 : index
    %c0_45 = arith.constant 0 : index
    %71 = memref.load %arg2[%c3_44, %c0_45] : memref<4x4xf32, #tpu.memory_space<smem>>
    %72 = vector.broadcast %71 : f32 to vector<1x256xf32>
    %73 = arith.mulf %1, %72 : vector<1x256xf32>
    %c3_46 = arith.constant 3 : index
    %c1_47 = arith.constant 1 : index
    %74 = memref.load %arg2[%c3_46, %c1_47] : memref<4x4xf32, #tpu.memory_space<smem>>
    %75 = vector.broadcast %74 : f32 to vector<1x256xf32>
    %76 = arith.mulf %3, %75 : vector<1x256xf32>
    %77 = arith.addf %73, %76 : vector<1x256xf32>
    %c3_48 = arith.constant 3 : index
    %c2_49 = arith.constant 2 : index
    %78 = memref.load %arg2[%c3_48, %c2_49] : memref<4x4xf32, #tpu.memory_space<smem>>
    %79 = vector.broadcast %78 : f32 to vector<1x256xf32>
    %80 = arith.mulf %5, %79 : vector<1x256xf32>
    %81 = arith.addf %77, %80 : vector<1x256xf32>
    %c3_50 = arith.constant 3 : index
    %c3_51 = arith.constant 3 : index
    %82 = memref.load %arg2[%c3_50, %c3_51] : memref<4x4xf32, #tpu.memory_space<smem>>
    %83 = vector.broadcast %82 : f32 to vector<1x256xf32>
    %84 = arith.mulf %7, %83 : vector<1x256xf32>
    %85 = arith.addf %81, %84 : vector<1x256xf32>
    %c3_52 = arith.constant 3 : index
    %86 = memref.load %arg3[%c3_52] : memref<4xf32, #tpu.memory_space<smem>>
    %87 = vector.broadcast %86 : f32 to vector<1x256xf32>
    %88 = arith.addf %85, %87 : vector<1x256xf32>
    %c0_53 = arith.constant 0 : index
    %c3_54 = arith.constant 3 : index
    %c0_55 = arith.constant 0 : index
    %89 = vector.load %arg5[%c0_53, %c3_54, %c0_55] : memref<1x4x256xf32, #tpu.memory_space<vmem>>, vector<1x1x256xf32>
    %90 = vector.shape_cast %89 : vector<1x1x256xf32> to vector<1x256xf32>
    %91 = vector.shape_cast %88 : vector<1x256xf32> to vector<1x1x256xf32>
    tpu.vector_store %arg5[%c0_53, %c3_54, %c0_55], %91 {strides = array<i32>} : memref<1x4x256xf32, #tpu.memory_space<vmem>>, vector<1x1x256xf32>,
    return
  }
  func.func @transform_0(%arg0: i32, %arg1: i32) -> (i32, i32) {
    %c0_i32 = arith.constant 0 : i32
    %c0_i32_0 = arith.constant 0 : i32
    %c0_i32_1 = arith.constant 0 : i32
    return %c0_i32, %c0_i32_0 : i32, i32
  }
  func.func @transform_1(%arg0: i32, %arg1: i32) -> i32 {
    %c0_i32 = arith.constant 0 : i32
    %c0_i32_0 = arith.constant 0 : i32
    return %c0_i32 : i32
  }
  func.func @transform_2(%arg0: i32, %arg1: i32) -> (i32, i32, i32) {
    %c0_i32 = arith.constant 0 : i32
    %c0_i32_0 = arith.constant 0 : i32
    return %arg0, %c0_i32, %arg1 : i32, i32, i32
  }
  func.func @transform_3(%arg0: i32, %arg1: i32) -> (i32, i32, i32) {
    %c0_i32 = arith.constant 0 : i32
    %c0_i32_0 = arith.constant 0 : i32
    return %arg0, %c0_i32, %arg1 : i32, i32, i32
  }
}

</mosaic_0001>

<bundles_post_ra>
// kernel: tpu_custom_call.1
= control target key start
LH: loop header
LB: loop body
LE: loop exit
PB: predicated region body
PF: predicated region fallthrough
CT: control target
= control target key end

     0   :  { %8 = vsyncpa [#allocation5], 0  ;;  %s1021_s0 = inlined_call_operand.hbm [shape: f32[4,4], index: 0, kind: input, shape index: {}]   ;;  %s1022_s1 = inlined_call_operand.vmem [shape: f32[4], index: 1, kind: input, shape index: {}]   ;;  %s1023_s2 = inlined_call_operand.hbm [shape: f32[2,4,256], index: 2, kind: input, shape index: {}]   ;;  %s1024_s3 = inlined_call_operand.hbm [shape: f32[2,4,256], index: 3, kind: output, shape index: {}]  }
   0x1   :  { %9 = vsyncpa [#allocation6], 0 }
   0x2   :  { %10 = vsyncpa [#allocation3], 0 }
   0x3   :  { %12 = vsyncpa [#allocation3 + $0x1], 0 }
   0x4   :  { %13 = vsyncpa [#allocation4], 0 }
   0x5   :  { %15 = vsyncpa [#allocation4 + $0x1], 0  ;;  %s749_s12 = smov 0   ;;  %s751_s13 = smov 0  }
   0x6   :  { %s753_s14 = smov 0   ;;  %s755_s15 = smov 0  }
   0x7   :  { %s757_s16 = smov 0   ;;  %s759_s17 = smov 0  }
   0x8 LB: > { %s447_s18 = sadd.s32 4294967295, %s723_s17   ;;  %s448_s19 = sadd.s32 4294967294, %s723_s17   ;;  %s723_s17 = sphi %s759_s17, %s21_s17   ;;  %s719_s16 = sphi %s757_s16, %s1049_s16   ;;  %s715_s15 = sphi %s755_s15, %s1048_s15   ;;  %s711_s14 = sphi %s753_s14, %s1047_s14   ;;  %s707_s13 = sphi %s751_s13, %s1046_s13   ;;  %s703_s12 = sphi %s749_s12, %s1045_s12  }
   0x9   : > { %p97_p0 = scmp.ne.s32.totalorder %s707_s13, %s703_s12  ;;  %p783_p1 = scmp.eq.s32.totalorder %s447_s18, 0 }
   0xa   : > { %p787_p2 = scmp.eq.s32.totalorder %s447_s18, 1  ;;  %p129_p3 = scmp.eq.s32.totalorder %s448_s19, 1 }
   0xb   : > { %s1029_s20 = scalar_select %p783_p1, 1, 0 }
   0xc   : > { %p793_p4 = por %p783_p1, %p97_p0  ;;  %p449_p5 = scmp.ge.s32.totalorder %s723_s17, 1 }
   0xd   : > { %p798_p6 = por %p129_p3, %p97_p0  ;;  %p136_p7 = scmp.lt.s32.totalorder %s723_s17, 3 }
   0xe   : > { %s1031_s22 = scalar_select %p793_p4, 1, 0 }
   0xf   : > { %s1032_s23 = scalar_select %p798_p6, 1, 0 }
  0x10   : > { %p803_p8 = pnand %p449_p5, %p136_p7  ;;  %s158_s27 = sshll.u32 %s1022_s1, 4  ;;  %s159_s27 = int_to_ptr.vmem [resolvable:$true] %s158_s27 }
  0x11   : > { %s33_s29 = sadd.s32 1, %s719_s16  ;;  %s575_s6 = scalar_lea.hbm %s1021_s0, 64 }
  0x12   : > { %s1033_s24 = scalar_select %p803_p8, 1, 0 }
  0x13   : > { %p504_p10 = pneg %p803_p8  ;;  %p820_p12 = scmp.ge.s32.totalorder %s33_s29, 2 }
  0x14   : > { %p576_p13 = scmp.ne.s32.totalorder %s1021_s0, %s575_s6  ;;  %p582_p7 = scmp.lt.u32.totalorder %s575_s6, %s1021_s0 }
  0x15   : > { %p815_p11 = pnand %p504_p10, %p783_p1 }
  0x17   : > { %p577_p0 = pneg %p815_p11 }
  0x19   : > { %p578_p3 = pnand %p577_p0, %p576_p13 }
  0x1b   : > { %p579_p5 = pneg %p578_p3 }
  0x1d   : > { %p584_p10 = pnand %p582_p7, %p579_p5 }
  0x1f   : > { %587 = shalt.err (!%p584_p10)
}
  0x20   : > { %s725_s11 = smov [#allocation2]   ;;  %s588_s25 = scalar_lea.vmem %s159_s27, 16 }
  0x21   : > { %507 = dma.hbm_to_smem (!%p815_p11), %s1021_s0, 64, %s725_s11, [#allocation5]  }
  0x22   : > { %p589_p9 = scmp.ne.s32.totalorder %s159_s27, %s588_s25  ;;  %p596_p1 = scmp.lt.s32.totalorder %s159_s27, %s159_s27 }
  0x23   : > { %p597_p13 = scmp.lt.s32.totalorder %s588_s25, %s588_s25 }
  0x24   : > { %p591_p6 = pnand %p589_p9, %p577_p0 }
  0x25   : > { %p598_p3 = por %p597_p13, %p596_p1 }
  0x26   : > { %p592_p4 = pneg %p591_p6 }
  0x28   : > { %p599_p8 = pnand %p598_p3, %p592_p4 }
  0x2a   : > { %602 = shalt.err (!%p599_p8)
}
  0x2b   : > { %s726_s26 = smov [#allocation7]   ;;  %s1051_s29 = smov (%p820_p12, %s33_s29), 0 }
  0x2c   : > { %510 = dma.vmem_to_smem (!%p815_p11), %s159_s27, 16, %s726_s26, [#allocation6]  }
  0x2d   : > { %s84_s4 = sadd.s32 1, %s711_s14  ;;  %p91_p1 = scmp.ne.s32.totalorder %s711_s14, %s707_s13 }
  0x2e   : > { %s79_s5 = ssub.s32 %s719_s16, %s1051_s29  ;;  %p92_p4 = scmp.eq.s32.totalorder %s723_s17, 0 }
  0x2f   : > { %p82_p6 = scmp.eq.s32.totalorder %s79_s5, 0  ;;  %p854_p8 = por %p787_p2, %p91_p1 }
  0x30   : > { %p93_p9 = por %p92_p4, %p91_p1  ;;  %p521_p0 = scmp.lt.s32.totalorder %s723_s17, 2 }
  0x31   : > { %s860_s6 = scalar_select %p82_p6, %s711_s14, %s84_s4  }
  0x32   : > { %s169_s7 = sand.u32 1, %s711_s14   ;;  %s490_s27 = sshll.u32 %s719_s16, 7 }
  0x33   : > { %s453_s30 = sshll.u32 %s169_s7, 3  ;;  %s867_s10 = scalar_lea.hbm %s1023_s2, %s490_s27 }
  0x34   : > { %s173_s21 = scalar_lea.vmem [#allocation8], %s453_s30  ;;  %p869_p2 = pnand %p521_p0, %p93_p9 }
  0x35   : > { %s183_s11 = sshll.u32 %s173_s21, 4  ;;  %s170_s19 = scalar_lea.sflag [#allocation3], %s169_s7  ;;  %s873_s11 = int_to_ptr.vmem [resolvable:$true] %s183_s11 }
  0x36   : > { %s603_s25 = scalar_lea.hbm %s867_s10, 128  ;;  %p605_p12 = pneg %p869_p2 }
  0x37   : > { %p604_p11 = scmp.ne.s32.totalorder %s867_s10, %s603_s25  ;;  %s608_s5 = scalar_lea.hbm %s1023_s2, 256 }
  0x38   : > { %p609_p10 = scmp.lt.u32.totalorder %s867_s10, %s1023_s2  ;;  %p610_p13 = scmp.lt.u32.totalorder %s608_s5, %s603_s25 }
  0x39   : > { %p606_p5 = pnand %p605_p12, %p604_p11  ;;  %p612_p1 = scmp.lt.u32.totalorder %s603_s25, %s867_s10 }
  0x3a   : > { %p611_p3 = por %p610_p13, %p609_p10 }
  0x3b   : > { %p607_p7 = pneg %p606_p5 }
  0x3c   : > { %p613_p4 = por %p612_p1, %p611_p3 }
  0x3e   : > { %p614_p6 = pnand %p613_p4, %p607_p7 }
  0x40   : > { %617 = shalt.err (!%p614_p6)
}
  0x41   : > { %s618_s7 = scalar_lea.vmem %s873_s11, 128  ;;  %s727_s8 = smov [#allocation8]  }
  0x42   : > { %p619_p9 = scmp.ne.s32.totalorder %s873_s11, %s618_s7  ;;  %s623_s9 = sshll.u32 %s727_s8, 4  ;;  %s624_s9 = int_to_ptr.vmem [resolvable:$false] %s623_s9 }
  0x43   : > { %s625_s21 = scalar_lea.vmem %s624_s9, 256  ;;  %p626_p5 = scmp.lt.s32.totalorder %s873_s11, %s624_s9 }
  0x44   : > { %p621_p0 = pnand %p619_p9, %p605_p12  ;;  %p627_p10 = scmp.lt.s32.totalorder %s625_s21, %s618_s7 }
  0x46   : > { %p622_p11 = pneg %p621_p0  ;;  %p628_p13 = por %p627_p10, %p626_p5 }
  0x48   : > { %p629_p3 = pnand %p628_p13, %p622_p11 }
  0x4a   : > { %632 = shalt.err (!%p629_p3)
}
  0x4b   : > { %514 = dma.hbm_to_vmem [thread:$0]  (!%p869_p2), %s867_s10, 128, %s873_s11, %s170_s19  }
  0x4c   : > { %p1038_p7 = scmp.ne.s32.totalorder %s1033_s24, 0 }
  0x4d   : > { %p1039_p12 = scmp.ne.s32.totalorder (!%p1038_p7), %s1029_s20, 0 }
  0x4e   : > { %192 = sbr.rel (%p1038_p7) target bundleno = 134 (0x86), region = 32 }
  0x55   : > { %686 = dma.done.wait (%p1039_p12), [#allocation5], 64  }
  0x56   : > { %688 = vsyncadd (%p1039_p12), [#allocation5], 4294967232 }
  0x57   : > { %690 = dma.done.wait (%p1039_p12), [#allocation6], 16  }
  0x58   : > { %692 = vsyncadd (%p1039_p12), [#allocation6], 4294967280  ;;  %s911_s18 = sand.u32 1, %s707_s13   ;;  %p1040_p2 = scmp.ne.s32.totalorder %s1031_s22, 0 }
  0x59   : > { %s459_s24 = sshll.u32 %s911_s18, 3  ;;  %s203_s10 = scalar_lea.sflag [#allocation3], %s911_s18 }
  0x5a   : > { %s206_s11 = scalar_lea.vmem [#allocation8], %s459_s24 }
  0x5b   : > { %694 = dma.done.wait (%p1040_p2), %s203_s10, 128  }
  0x5c   : > { %696 = vsyncadd (%p1040_p2), %s203_s10, 4294967168 }
  0x5d   : > { %211 = sfence }
  0x5e   : > { %s239_s19 = sld [smem:[#allocation2]]  ;;  %v232_v0 = vld [vmem:[%s206_s11] ss:$4 sm:$0x3]  ;;  %s464_s20 = sld [smem:[#allocation2 + $0x1]]  ;;  %v257_v5 = vlaneseq }
  0x5f   : > { %s465_s25 = sld [smem:[#allocation2 + $0x2]]  ;;  %s466_s26 = sld [smem:[#allocation2 + $0x3]]  ;;  %v461_v1 = vld [vmem:[%s206_s11 + $0x1] ss:$4 sm:$0x3] }
  0x60   : > { %s921_s4 = sld [smem:[#allocation7]]  ;;  %v462_v2 = vld [vmem:[%s206_s11 + $0x2] ss:$4 sm:$0x3]  ;;  %s468_s27 = sld [smem:[#allocation2 + $0x81]]  ;;  %vm934_vm0 = vcmp.lt.s32.totalorder %v257_v5, 256 }
  0x61   : > { %s467_s5 = sld [smem:[#allocation2 + $0x80]]  ;;  %v923_v3 = vld [vmem:[%s206_s11 + $0x3] ss:$4 sm:$0x3]  ;;  %s469_s30 = sld [smem:[#allocation2 + $0x82]] }
  0x62   : > { %s470_s7 = sld [smem:[#allocation2 + $0x83]]  ;;  %s925_s22 = sld [smem:[#allocation7 + $0x1]] }
  0x63   : > { %s473_s8 = sld [smem:[#allocation2 + $0x100]]  ;;  %s474_s9 = sld [smem:[#allocation2 + $0x101]] }
  0x64   : > { %v240_v4 = vstv %s239_s19  ;;  %v243_v7 = vstv %s464_s20  ;;  %s927_s21 = sld [smem:[#allocation2 + $0x102]]  ;;  %s929_s10 = sld [smem:[#allocation2 + $0x103]] }
  0x65   : > { %v241_v6 = vmul.f32 %v240_v4, %v232_v0  ;;  %v244_v8 = vmul.f32 %v461_v1, %v243_v7  ;;  %v247_v9 = vstv %s465_s25  ;;  %v251_v10 = vstv %s466_s26  ;;  %s931_s11 = sld [smem:[#allocation2 + $0x180]]  ;;  %s938_s19 = sld [smem:[#allocation2 + $0x181]] }
  0x66   : > { %v248_v11 = vmul.f32 %v462_v2, %v247_v9  ;;  %v252_v12 = vmul.f32 %v923_v3, %v251_v10  ;;  %s940_s20 = sld [smem:[#allocation2 + $0x182]]  ;;  %v266_v17 = vstv %s468_s27  ;;  %s944_s26 = sld [smem:[#allocation2 + $0x183]]  ;;  %v255_v19 = vstv %s921_s4 }
  0x67   : > { %v263_v14 = vstv %s467_s5  ;;  %v245_v15 = vadd.f32 %v244_v8, %v241_v6  ;;  %v270_v18 = vstv %s469_s30  ;;  %s942_s25 = sld [smem:[#allocation7 + $0x2]]  ;;  %v267_v20 = vmul.f32 %v461_v1, %v266_v17  ;;  %s483_s4 = sld [smem:[#allocation7 + $0x3]] }
  0x68   : > { %v264_v16 = vmul.f32 %v263_v14, %v232_v0  ;;  %v271_v21 = vmul.f32 %v462_v2, %v270_v18  ;;  %v274_v22 = vstv %s470_s7  ;;  %v278_v32 = vstv %s925_s22  ;;  %s229_s5 = scalar_lea.vmem [#allocation9], %s459_s24  ;;  %s491_s27 = sshll.u32 %s715_s15, 7 }
  0x69   : > { %v249_v23 = vadd.f32 %v248_v11, %v245_v15  ;;  %v275_v24 = vmul.f32 %v923_v3, %v274_v22  ;;  %v283_v25 = vstv %s473_s8  ;;  %v286_v26 = vstv %s474_s9  ;;  %s339_s24 = sshll.u32 %s229_s5, 4  ;;  %s970_s22 = scalar_lea.hbm %s1024_s3, %s491_s27  ;;  %s972_s24 = int_to_ptr.vmem [resolvable:$true] %s339_s24 }
  0x6a   : > { %v268_v27 = vadd.f32 %v267_v20, %v264_v16  ;;  %v284_v28 = vmul.f32 %v283_v25, %v232_v0  ;;  %v287_v29 = vmul.f32 %v461_v1, %v286_v26  ;;  %v290_v30 = vstv %s927_s21  ;;  %s323_s15 = scalar_lea.sflag [#allocation4], %s911_s18  ;;  %s633_s8 = scalar_lea.vmem %s972_s24, 128 }
  0x6b   : > { %v253_v31 = vadd.f32 %v252_v12, %v249_v23  ;;  %v291_v33 = vmul.f32 %v462_v2, %v290_v30  ;;  %v294_v34 = vstv %s929_s10  ;;  %v303_v38 = vstv %s931_s11  ;;  %p634_p1 = scmp.ne.s32.totalorder %s972_s24, %s633_s8  ;;  %s728_s9 = smov [#allocation9]  }
  0x6c   : > { %v272_v35 = vadd.f32 %v271_v21, %v268_v27  ;;  %v288_v36 = vadd.f32 %v287_v29, %v284_v28  ;;  %v295_v37 = vmul.f32 %v923_v3, %v294_v34  ;;  %v304_v40 = vmul.f32 %v303_v38, %v232_v0  ;;  %s637_s21 = sshll.u32 %s728_s9, 4  ;;  %s638_s21 = int_to_ptr.vmem [resolvable:$false] %s637_s21 }
  0x6d   : > { %v256_v39 = vadd.f32 %v255_v19, %v253_v31  ;;  %v306_v41 = vstv %s938_s19  ;;  %v310_v42 = vstv %s940_s20  ;;  %v298_v47 = vstv %s942_s25  ;;  %p635_p4 = pnand %p634_p1, %p854_p8  ;;  %s639_s10 = scalar_lea.vmem %s638_s21, 256 }
  0x6e   : > { %v276_v43 = vadd.f32 %v275_v24, %v272_v35  ;;  %v292_v44 = vadd.f32 %v291_v33, %v288_v36  ;;  %v307_v45 = vmul.f32 %v461_v1, %v306_v41  ;;  %v311_v46 = vmul.f32 %v462_v2, %v310_v42  ;;  %p640_p9 = scmp.lt.s32.totalorder %s972_s24, %s638_s21  ;;  %p641_p0 = scmp.lt.s32.totalorder %s639_s10, %s633_s8 }
  0x6f   : > { %261 = vst.msk [vmem:[%s229_s5] ss:$4 sm:$0x3] %vm934_vm0, %v256_v39  ;;  %v314_v48 = vstv %s944_s26  ;;  %v318_v55 = vstv %s483_s4  ;;  %p636_p6 = pneg %p635_p4 }
  0x70   : > { %v279_v49 = vadd.f32 %v278_v32, %v276_v43  ;;  %v296_v50 = vadd.f32 %v295_v37, %v292_v44  ;;  %v308_v51 = vadd.f32 %v307_v45, %v304_v40  ;;  %v315_v52 = vmul.f32 %v923_v3, %v314_v48  ;;  %p642_p11 = por %p641_p0, %p640_p9 }
  0x72   : > { %472 = vst.msk [vmem:[%s229_s5 + $0x1] ss:$4 sm:$0x3] %vm934_vm0, %v279_v49  ;;  %v299_v53 = vadd.f32 %v298_v47, %v296_v50  ;;  %v312_v54 = vadd.f32 %v311_v46, %v308_v51  ;;  %p643_p5 = pnand %p642_p11, %p636_p6 }
  0x74   : > { %478 = vst.msk [vmem:[%s229_s5 + $0x2] ss:$4 sm:$0x3] %vm934_vm0, %v299_v53  ;;  %v316_v56 = vadd.f32 %v315_v52, %v312_v54 }
  0x76   : > { %v319_v57 = vadd.f32 %v318_v55, %v316_v56 }
  0x78   : > { %484 = vst.msk [vmem:[%s229_s5 + $0x3] ss:$4 sm:$0x3] %vm934_vm0, %v319_v57 }
  0x79   : > { %646 = shalt.err (!%p643_p5)
}
  0x7a   : > { %s647_s18 = scalar_lea.hbm %s970_s22, 128  ;;  %s651_s20 = scalar_lea.hbm %s1024_s3, 256 }
  0x7b   : > { %p648_p10 = scmp.ne.s32.totalorder %s970_s22, %s647_s18  ;;  %p652_p7 = scmp.lt.u32.totalorder %s970_s22, %s1024_s3 }
  0x7c   : > { %p653_p12 = scmp.lt.u32.totalorder %s651_s20, %s647_s18  ;;  %p655_p1 = scmp.lt.u32.totalorder %s647_s18, %s970_s22 }
  0x7d   : > { %p649_p13 = pnand %p648_p10, %p854_p8 }
  0x7e   : > { %p654_p2 = por %p653_p12, %p652_p7 }
  0x7f   : > { %p650_p3 = pneg %p649_p13 }
  0x80   : > { %p656_p4 = por %p655_p1, %p654_p2 }
  0x82   : > { %p657_p6 = pnand %p656_p4, %p650_p3 }
  0x84   : > { %660 = shalt.err (!%p657_p6)
}
  0x85   : > { %502 = dma.vmem_to_hbm [thread:$0]  (%p854_p8), %s972_s24, 128, %s970_s22, %s323_s15  }
  0x86 PF: > { %s351_s4 = sand.u32 1, %s703_s12   ;;  %p1043_p9 = scmp.ne.s32.totalorder %s1032_s23, 0 }
  0x87   : > { %p1044_p0 = scmp.ge.s32.totalorder %s723_s17, 2  ;;  %s352_s5 = scalar_lea.sflag [#allocation4], %s351_s4 }
  0x89   : > { %p516_p11 = pnand %p1044_p0, %p1043_p9 }
  0x8b   : > { %698 = dma.done.wait (!%p516_p11), %s352_s5, 128  }
  0x8c   : > { %700 = vsyncadd (!%p516_p11), %s352_s5, 4294967168  ;;  %s21_s17 = sadd.s32 1, %s723_s17   ;;  %s1045_s12 = smov %s707_s13 }
  0x8d   : > { %p18_p5 = scmp.ge.s32.totalorder %s21_s17, 4   ;;  %s1046_s13 = smov %s711_s14 }
  0x8e   : > { %s1047_s14 = smov %s860_s6  ;;  %s1048_s15 = smov %s719_s16 }
  0x8f   : > { %s1049_s16 = smov %s1051_s29  ;;  %20 = sbr.rel (!%p18_p5) target bundleno = 8 (0x8), region = 93 }
  0x96   :  { %357 = vsyncpa [#allocation3], 1 }
  0x97   :  { %359 = vsyncpa [#allocation3 + $0x1], 1 }
  0x98   :  { %360 = vsyncpa [#allocation4], 1 }
  0x99   :  { %362 = vsyncpa [#allocation4 + $0x1], 1 }
  0x9a   :  { %363 = vsyncpa [#allocation5], 1 }
  0x9b   :  { %365 = vsyncpa [#allocation5 + $0x1], 1 }
  0x9c   :  { %366 = vsyncpa [#allocation6], 1 }
  0x9d   :  { %368 = vsyncpa [#allocation6 + $0x1], 1 }

</bundles_post_ra>
